<compile_context>
chip_gen: v7x
topology: tpu7x:2x2x1
jax: 0.10.0
libtpu: 0.0.40
codegen_flags: <defaults>
</compile_context>

<pallas_src>
import math
import jax
import jax.numpy as jnp
from jax.experimental import pallas as pl
from jax.experimental.pallas import tpu as pltpu


def _round_up(n, m):
    return ((n + m - 1) // m) * m


def mlp_kernel(xT_ref, w1_ref, b1_ref, w2_ref, b2_ref, outT_ref):
    # xT_ref: (I, Bt) compute_dtype   w1_ref: (H1, I)   b1_ref: (H1, 1) f32
    # w2_ref: (O, H1)                 b2_ref: (O, 1) f32  outT_ref: (O, Bt)
    x = xT_ref[...]

    # Linear1 on the MXU with f32 accumulation; bias + ReLU in f32 on the VPU.
    h = jnp.dot(w1_ref[...], x, preferred_element_type=jnp.float32)      # (H1, Bt)
    h = jnp.maximum(h + b1_ref[...], 0.0)

    # BatchNorm affine is already folded into w2/b2 (wrapper) — nothing to do here.

    # Linear2 on the MXU (narrow h back to the matmul dtype) + bias.
    h = h.astype(w2_ref.dtype)
    y = jnp.dot(w2_ref[...], h, preferred_element_type=jnp.float32) + b2_ref[...]
    outT_ref[...] = y.astype(outT_ref.dtype)                             # (O, Bt)


def mlp_forward(x, w1, b1, gamma, beta, running_mean, running_var, w2, b2,
                *, eps=1e-5, batch_tile=512, compute_dtype=jnp.bfloat16):
    """Fused MLP forward.

    x:  [B, num_i]
    w1: [num_h1, num_i]  b1: [num_h1]      (PyTorch nn.Linear layout)
    w2: [num_o, num_h1]  b2: [num_o]
    returns [B, num_o] in x.dtype.
    """
    B, I = x.shape
    H1 = w1.shape[0]
    O = w2.shape[0]
    f32 = jnp.float32

    # ---- Fold BatchNorm (inference) affine into the second linear (zero runtime cost).
    scale = gamma.astype(f32) * jax.lax.rsqrt(running_var.astype(f32) + eps)   # (H1,)
    shift = beta.astype(f32) - running_mean.astype(f32) * scale                # (H1,)
    w2_eff = w2.astype(f32) * scale[None, :]                                   # (O, H1)
    b2_eff = w2.astype(f32) @ shift + b2.astype(f32)                           # (O,)

    # ---- Batch-on-lanes layout: pad B up to a multiple of the (>=128) lane tile.
    bt = max(128, min(int(batch_tile), _round_up(B, 128)))
    bt = _round_up(bt, 128)
    B_pad = _round_up(B, bt)
    grid = (B_pad // bt,)

    xT = jnp.pad(x.T.astype(compute_dtype), ((0, 0), (0, B_pad - B)))          # (I, B_pad)
    w1_c = w1.astype(compute_dtype)                                            # (H1, I)
    w2_c = w2_eff.astype(compute_dtype)                                        # (O, H1)
    b1_col = b1.astype(f32).reshape(H1, 1)
    b2_col = b2_eff.reshape(O, 1)

    resident = lambda i: (0, 0)   # weights / bias columns: same block every grid step

    itemsize = jnp.dtype(compute_dtype).itemsize
    cost = pl.CostEstimate(
        flops=2 * B_pad * (I * H1 + H1 * O),
        transcendentals=0,
        bytes_accessed=(xT.size * itemsize + O * B_pad * x.dtype.itemsize
                        + (w1_c.size + w2_c.size) * itemsize + (H1 + O) * 4),
    )

    outT = pl.pallas_call(
        mlp_kernel,
        out_shape=jax.ShapeDtypeStruct((O, B_pad), x.dtype),
        grid_spec=pltpu.PrefetchScalarGridSpec(
            num_scalar_prefetch=0,
            grid=grid,
            in_specs=[
                pl.BlockSpec((I, bt), lambda i: (0, i)),    # x^T batch tile (lane-major)
                pl.BlockSpec((H1, I), resident),            # W1
                pl.BlockSpec((H1, 1), resident),            # b1 (column)
                pl.BlockSpec((O, H1), resident),            # W2 (BN-folded)
                pl.BlockSpec((O, 1), resident),             # b2 (BN-folded, column)
            ],
            out_specs=pl.BlockSpec((O, bt), lambda i: (0, i)),
        ),
        compiler_params=pltpu.CompilerParams(
            dimension_semantics=("parallel",)),
        cost_estimate=cost,
    )(xT, w1_c, b1_col, w2_c, b2_col)

    return outT[:, :B].T                                                       # (B, O)


def _reference(x, w1, b1, gamma, beta, running_mean, running_var, w2, b2, eps=1e-5):
    """Pure-JAX f32 reference mirroring the PyTorch forward (eval-mode BatchNorm)."""
    h = jnp.maximum(x @ w1.T + b1, 0.0)
    h = (h - running_mean) * jax.lax.rsqrt(running_var + eps) * gamma + beta
    return h @ w2.T + b2


if __name__ == "__main__":
    # Small shapes consistent with the module: MLP(num_i=32, num_h1=64, num_h2=48, num_o=16)
    B, num_i, num_h1, num_o = 16, 32, 64, 16

    key = jax.random.PRNGKey(0)
    kx, kw1, kb1, kw2, kb2, kg, kbeta, km, kv = jax.random.split(key, 9)

    # Deterministic parameter init (PyTorch nn.Linear default: U(-1/sqrt(fan_in), +1/sqrt(fan_in))),
    # in PyTorch layout: w1 [H1, I], w2 [O, H1].
    s1 = 1.0 / math.sqrt(num_i)
    w1 = jax.random.uniform(kw1, (num_h1, num_i), jnp.float32, minval=-s1, maxval=s1)
    b1 = jax.random.uniform(kb1, (num_h1,), jnp.float32, minval=-s1, maxval=s1)

    s2 = 1.0 / math.sqrt(num_h1)
    w2 = jax.random.uniform(kw2, (num_o, num_h1), jnp.float32, minval=-s2, maxval=s2)
    b2 = jax.random.uniform(kb2, (num_o,), jnp.float32, minval=-s2, maxval=s2)

    # BatchNorm1d parameters / running stats (randomized so the test is meaningful).
    gamma = jax.random.uniform(kg, (num_h1,), jnp.float32, minval=0.5, maxval=1.5)
    beta = jax.random.normal(kbeta, (num_h1,), jnp.float32) * 0.1
    running_mean = jax.random.normal(km, (num_h1,), jnp.float32) * 0.1
    running_var = jax.random.uniform(kv, (num_h1,), jnp.float32, minval=0.5, maxval=1.5)

    x = jax.random.normal(kx, (B, num_i), jnp.float32)

    ref = _reference(x, w1, b1, gamma, beta, running_mean, running_var, w2, b2)

    # 1) f32 matmul path: tight check validates the BN fold + layout exactly.
    out_f32 = mlp_forward(x, w1, b1, gamma, beta, running_mean, running_var, w2, b2,
                          compute_dtype=jnp.float32)
    out_f32 = jax.block_until_ready(out_f32)
    assert out_f32.shape == (B, num_o)
    assert jnp.allclose(out_f32, ref, atol=1e-4, rtol=1e-5), "f32 kernel mismatch vs reference"

    # 2) Default bf16 streaming path (v6e/v7x perf config): looser tolerance.
    out_bf16 = mlp_forward(x, w1, b1, gamma, beta, running_mean, running_var, w2, b2)
    out_bf16 = jax.block_until_ready(out_bf16)
    assert out_bf16.shape == (B, num_o)
    assert jnp.allclose(out_bf16, ref, atol=3e-2, rtol=3e-2), "bf16 kernel mismatch vs reference"

    print("KERNEL_OK")
</pallas_src>

<mosaic_0001>
module attributes {stable_mosaic.version = 11 : i64} {
  func.func @mlp_kernel(%arg0: i32, %arg1: memref<32x128xf32, #tpu.memory_space<vmem>>, %arg2: memref<64x32xf32, #tpu.memory_space<vmem>>, %arg3: memref<64x1xf32, #tpu.memory_space<vmem>>, %arg4: memref<16x64xf32, #tpu.memory_space<vmem>>, %arg5: memref<16x1xf32, #tpu.memory_space<vmem>>, %arg6: memref<16x128xf32, #tpu.memory_space<vmem>>) attributes {dimension_semantics = [#tpu.dimension_semantics<parallel>], iteration_bounds = array<i64: 1>, scalar_prefetch = 0 : i64, scratch_operands = 0 : i64, tpu.core_type = #tpu.core_type<tc>, window_params = [{transform_indices = @transform_0, window_bounds = array<i64: 32, 128>}, {pipeline_mode = #tpu.pipeline_mode<synchronous>, transform_indices = @transform_1, window_bounds = array<i64: 64, 32>}, {pipeline_mode = #tpu.pipeline_mode<synchronous>, transform_indices = @transform_2, window_bounds = array<i64: 64, 1>}, {pipeline_mode = #tpu.pipeline_mode<synchronous>, transform_indices = @transform_3, window_bounds = array<i64: 16, 64>}, {pipeline_mode = #tpu.pipeline_mode<synchronous>, transform_indices = @transform_4, window_bounds = array<i64: 16, 1>}, {transform_indices = @transform_5, window_bounds = array<i64: 16, 128>}]} {
    %c0 = arith.constant 0 : index
    %c0_0 = arith.constant 0 : index
    %0 = vector.load %arg1[%c0, %c0_0] : memref<32x128xf32, #tpu.memory_space<vmem>>, vector<32x128xf32>
    %c0_1 = arith.constant 0 : index
    %c0_2 = arith.constant 0 : index
    %1 = vector.load %arg2[%c0_1, %c0_2] : memref<64x32xf32, #tpu.memory_space<vmem>>, vector<64x32xf32>
    %cst = arith.constant dense<0.000000e+00> : vector<64x128xf32>
    %2 = tpu.matmul %1, %0, %cst {dimension_numbers = #tpu.dot_dimension_numbers<[1], [0], [0], [1], [0, 0, 1, 1], [], []>} : vector<64x32xf32>, vector<32x128xf32>, vector<64x128xf32> -> vector<64x128xf32>
    %c0_3 = arith.constant 0 : index
    %c0_4 = arith.constant 0 : index
    %3 = vector.load %arg3[%c0_3, %c0_4] : memref<64x1xf32, #tpu.memory_space<vmem>>, vector<64x1xf32>
    %4 = vector.broadcast %3 : vector<64x1xf32> to vector<64x128xf32>
    %5 = arith.addf %2, %4 : vector<64x128xf32>
    %cst_5 = arith.constant 0.000000e+00 : f32
    %6 = vector.broadcast %cst_5 : f32 to vector<64x128xf32>
    %7 = arith.maximumf %5, %6 : vector<64x128xf32>
    %c0_6 = arith.constant 0 : index
    %c0_7 = arith.constant 0 : index
    %8 = vector.load %arg4[%c0_6, %c0_7] : memref<16x64xf32, #tpu.memory_space<vmem>>, vector<16x64xf32>
    %cst_8 = arith.constant dense<0.000000e+00> : vector<16x128xf32>
    %9 = tpu.matmul %8, %7, %cst_8 {dimension_numbers = #tpu.dot_dimension_numbers<[1], [0], [0], [1], [0, 0, 1, 1], [], []>} : vector<16x64xf32>, vector<64x128xf32>, vector<16x128xf32> -> vector<16x128xf32>
    %c0_9 = arith.constant 0 : index
    %c0_10 = arith.constant 0 : index
    %10 = vector.load %arg5[%c0_9, %c0_10] : memref<16x1xf32, #tpu.memory_space<vmem>>, vector<16x1xf32>
    %11 = vector.broadcast %10 : vector<16x1xf32> to vector<16x128xf32>
    %12 = arith.addf %9, %11 : vector<16x128xf32>
    %c0_11 = arith.constant 0 : index
    %c0_12 = arith.constant 0 : index
    %13 = vector.load %arg6[%c0_11, %c0_12] : memref<16x128xf32, #tpu.memory_space<vmem>>, vector<16x128xf32>
    tpu.vector_store %arg6[%c0_11, %c0_12], %12 {strides = array<i32>} : memref<16x128xf32, #tpu.memory_space<vmem>>, vector<16x128xf32>,
    return
  }
  func.func @transform_0(%arg0: i32) -> (i32, i32) {
    %c0_i32 = arith.constant 0 : i32
    %c0_i32_0 = arith.constant 0 : i32
    return %c0_i32, %arg0 : i32, i32
  }
  func.func @transform_1(%arg0: i32) -> (i32, i32) {
    %c0_i32 = arith.constant 0 : i32
    %c0_i32_0 = arith.constant 0 : i32
    %c0_i32_1 = arith.constant 0 : i32
    return %c0_i32, %c0_i32_0 : i32, i32
  }
  func.func @transform_2(%arg0: i32) -> (i32, i32) {
    %c0_i32 = arith.constant 0 : i32
    %c0_i32_0 = arith.constant 0 : i32
    %c0_i32_1 = arith.constant 0 : i32
    return %c0_i32, %c0_i32_0 : i32, i32
  }
  func.func @transform_3(%arg0: i32) -> (i32, i32) {
    %c0_i32 = arith.constant 0 : i32
    %c0_i32_0 = arith.constant 0 : i32
    %c0_i32_1 = arith.constant 0 : i32
    return %c0_i32, %c0_i32_0 : i32, i32
  }
  func.func @transform_4(%arg0: i32) -> (i32, i32) {
    %c0_i32 = arith.constant 0 : i32
    %c0_i32_0 = arith.constant 0 : i32
    %c0_i32_1 = arith.constant 0 : i32
    return %c0_i32, %c0_i32_0 : i32, i32
  }
  func.func @transform_5(%arg0: i32) -> (i32, i32) {
    %c0_i32 = arith.constant 0 : i32
    %c0_i32_0 = arith.constant 0 : i32
    return %c0_i32, %arg0 : i32, i32
  }
}

</mosaic_0001>

<bundles_post_ra>
// kernel: tpu_custom_call.1
= control target key start
LH: loop header
LB: loop body
LE: loop exit
PB: predicated region body
PF: predicated region fallthrough
CT: control target
= control target key end

     0   :  { %vm81_vm0 = vcmask 261120   ;;  %v458_v6 = vmov 0   ;;  %s586_s0 = inlined_call_operand.vmem [shape: f32[32,128], index: 0, kind: input, shape index: {}]   ;;  %s587_s1 = inlined_call_operand.vmem [shape: f32[64,32], index: 1, kind: input, shape index: {}]   ;;  %s588_s2 = inlined_call_operand.vmem [shape: f32[64,1], index: 2, kind: input, shape index: {}]   ;;  %s589_s3 = inlined_call_operand.vmem [shape: f32[16,64], index: 3, kind: input, shape index: {}]   ;;  %s590_s4 = inlined_call_operand.vmem [shape: f32[16,1], index: 4, kind: input, shape index: {}]   ;;  %s591_s5 = inlined_call_operand.hbm [shape: f32[16,128], index: 5, kind: output, shape index: {}]  }
   0x1   :  { %v21_v0 = vld [vmem:[%s586_s0] sm:$0xff]  ;;  %v22_v1 = vld [vmem:[%s586_s0 + $0x8] sm:$0xff]  ;;  %v23_v2 = vld [vmem:[%s586_s0 + $0x10] sm:$0xff]  ;;  %432 = vset.pattern.permute.xlu0 %v458_v6  ;;  %433 = vset.pattern.permute.xlu1 %v458_v6 }
   0x2   :  { %v404_v3 = vpack.c.bf16 %v22_v1, %v21_v0  ;;  %v24_v4 = vld [vmem:[%s586_s0 + $0x18] sm:$0xff]  ;;  %v25_v5 = vld [vmem:[%s587_s1] sm:$0xff]  ;;  %v35_v9 = vld [vmem:[%s588_s2 + $0x10] sm:$0xff] }
   0x3   :  { %v408_v7 = vpack.c.bf16 %v24_v4, %v23_v2  ;;  %373 = vmatprep.mubr.msk.f32.mxu0 %vm81_vm0, %v25_v5  ;;  %v33_v8 = vld [vmem:[%s588_s2] sm:$0xff]  ;;  %53 = vperm.xlu1 %433, %v35_v9   ;;  %v34_v10 = vld [vmem:[%s588_s2 + $0x8] sm:$0xff]  ;;  %v36_v11 = vld [vmem:[%s588_s2 + $0x18] sm:$0xff] }
   0x4   :  { %405 = vmatprep.subr.bf16.mxu0 %v404_v3  ;;  %43 = vperm.xlu0 %432, %v33_v8  }
   0x5   :  { %407 = vmatpush3.bf16.msra.mxu0 %v404_v3 }
   0x6   :  { %409 = vmatprep.subr.bf16.mxu0 %v408_v7 }
   0x7   :  { %10 = vsyncpa [#allocation3], 0  ;;  %v26_v12 = vld [vmem:[%s587_s1 + $0x8] sm:$0xff]  ;;  %v27_v13 = vld [vmem:[%s587_s1 + $0x10] sm:$0xff]  ;;  %58 = vperm.xlu1 %433, %v36_v11   ;;  %vm233_vm1 = vcmask 523264   ;;  %s459_s11 = smov [#allocation2]  }
   0x8   :  { %48 = vperm.xlu0 %432, %v34_v10   ;;  %v37_v14 = vld [vmem:[%s588_s2 + $0x20] sm:$0xff]  ;;  %v38_v15 = vld [vmem:[%s588_s2 + $0x28] sm:$0xff]  ;;  %v28_v16 = vld [vmem:[%s587_s1 + $0x18] sm:$0xff]  ;;  %s322_s12 = sshll.u32 %s459_s11, 4  ;;  %s323_s12 = int_to_ptr.vmem [resolvable:$true] %s322_s12 }
   0x9   :  { %411 = vmatpush3.bf16.msra.mxu0 %v408_v7  ;;  %v29_v17 = vld [vmem:[%s587_s1 + $0x20] sm:$0xff]  ;;  %v39_v18 = vld [vmem:[%s588_s2 + $0x30] sm:$0xff]  ;;  %v40_v19 = vld [vmem:[%s588_s2 + $0x38] sm:$0xff]  ;;  %s434_s13 = scalar_lea.vmem %s323_s12, 256  ;;  %p439_p1 = scmp.lt.s32.totalorder %s323_s12, %s323_s12 }
   0xa   :  { %v30_v20 = vld [vmem:[%s587_s1 + $0x28] sm:$0xff]  ;;  %v31_v21 = vld [vmem:[%s587_s1 + $0x30] sm:$0xff]  ;;  %v221_v22 = vld [vmem:[%s590_s4] sm:$0xff]  ;;  %p435_p0 = scmp.ne.s32.totalorder %s323_s12, %s434_s13  ;;  %p440_p2 = scmp.lt.s32.totalorder %s434_s13, %s434_s13 }
   0xb   :  { %68 = vperm.xlu1 %433, %v38_v15   ;;  %v222_v23 = vld [vmem:[%s590_s4 + $0x8] sm:$0xff]  ;;  %v32_v24 = vld [vmem:[%s587_s1 + $0x38] sm:$0xff]  ;;  %v219_v25 = vld [vmem:[%s589_s3] sm:$0xff] }
   0xc   :  { %374 = vmatmul.mubr.msk.f32.vlgmr.msra.gmra.mrb[0].mxu0 %vm81_vm0, %v26_v12  ;;  %63 = vperm.xlu0 %432, %v37_v14   ;;  %v220_v62 = vld [vmem:[%s589_s3 + $0x8] sm:$0xff]  ;;  %p441_p3 = por %p440_p2, %p439_p1 }
   0xd   :  { %376 = vmatprep.mubr.msk.f32.mxu0 %vm81_vm0, %v27_v13  ;;  %401 = vmatprep.mubr.msk.f32.mxu1 %vm233_vm1, %v219_v25 }
   0xe   :  { %p442_p4 = pnand %p441_p3, %p435_p0 }
   0xf   :  { %78 = vperm.xlu1 %433, %v40_v19  }
  0x10   :  { %377 = vmatmul.mubr.msk.f32.gmra.mrb[2].mxu0 %vm81_vm0, %v28_v16  ;;  %73 = vperm.xlu0 %432, %v39_v18  }
  0x11   :  { %379 = vmatprep.mubr.msk.f32.mxu0 %vm81_vm0, %v29_v17 }
  0x13   :  { %230 = vperm.xlu1 %433, %v222_v23  }
  0x14   :  { %380 = vmatmul.mubr.msk.f32.gmra.mrb[4].mxu0 %vm81_vm0, %v30_v20  ;;  %225 = vperm.xlu0 %432, %v221_v22  }
  0x15   :  { %382 = vmatprep.mubr.msk.f32.mxu0 %vm81_vm0, %v31_v21 }
  0x18   :  { %383 = vmatmul.mubr.msk.f32.gmra.mrb[6].mxu0 %vm81_vm0, %v32_v24 }
  0x82   :  { %v54_v27 = vpop.permute.xlu1 %53 }
  0x83   :  { %v44_v26 = vpop.permute.xlu0 %43 }
  0x86   :  { %v59_v29 = vpop.permute.xlu1 %58 }
  0x87   :  { %v49_v28 = vpop.permute.xlu0 %48 }
  0x8a   :  { %v69_v39 = vpop.permute.xlu1 %68 }
  0x8b   :  { %v64_v42 = vpop.permute.xlu0 %63 }
  0x8e   :  { %v79_v51 = vpop.permute.xlu1 %78 }
  0x8f   :  { %v74_v54 = vpop.permute.xlu0 %73 }
  0x92   :  { %v231_v63 = vpop.permute.xlu1 %230 }
  0x93   :  { %v226_v1 = vpop.permute.xlu0 %225 }
  0xdf   :  { %v375_v30 = vpop.f32.mrb[0].mxu0 }
  0xe0   :  { %v178_v31 = vadd.f32 %v375_v30, %v49_v28  ;;  %v172_v32 = vpop.f32.mrb[1].mxu0 }
  0xe1   :  { %v173_v33 = vadd.f32 %v172_v32, %v44_v26 }
  0xe2   :  { %v212_v34 = vmax.f32 %v178_v31, 0.0 }
  0xe3   :  { %v211_v35 = vmax.f32 %v173_v33, 0.0  ;;  %v378_v36 = vpop.f32.mrb[2].mxu0 }
  0xe4   :  { %v188_v37 = vadd.f32 %v378_v36, %v59_v29  ;;  %v182_v38 = vpop.f32.mrb[3].mxu0 }
  0xe5   :  { %v183_v40 = vadd.f32 %v182_v38, %v54_v27  ;;  %v412_v41 = vpack.c.bf16 %v212_v34, %v211_v35 }
  0xe6   :  { %v214_v43 = vmax.f32 %v188_v37, 0.0 }
  0xe7   :  { %v213_v44 = vmax.f32 %v183_v40, 0.0  ;;  %v381_v45 = vpop.f32.mrb[4].mxu0  ;;  %413 = vmatprep.subr.bf16.mxu1 %v412_v41 }
  0xe8   :  { %v198_v46 = vadd.f32 %v381_v45, %v69_v39  ;;  %v192_v47 = vpop.f32.mrb[5].mxu0  ;;  %415 = vmatpush3.bf16.msra.mxu1 %v412_v41 }
  0xe9   :  { %v416_v48 = vpack.c.bf16 %v214_v43, %v213_v44  ;;  %v193_v49 = vadd.f32 %v192_v47, %v64_v42 }
  0xea   :  { %v216_v50 = vmax.f32 %v198_v46, 0.0 }
  0xeb   :  { %v215_v52 = vmax.f32 %v193_v49, 0.0  ;;  %v384_v53 = vpop.f32.mrb[6].mxu0  ;;  %417 = vmatprep.subr.bf16.mxu1 %v416_v48 }
  0xec   :  { %v208_v55 = vadd.f32 %v384_v53, %v79_v51  ;;  %v202_v56 = vpop.f32.mrb[7].mxu0  ;;  %419 = vmatpush3.bf16.msra.mxu1 %v416_v48 }
  0xed   :  { %v420_v57 = vpack.c.bf16 %v216_v50, %v215_v52  ;;  %v203_v58 = vadd.f32 %v202_v56, %v74_v54 }
  0xee   :  { %v218_v59 = vmax.f32 %v208_v55, 0.0 }
  0xef   :  { %v217_v60 = vmax.f32 %v203_v58, 0.0  ;;  %421 = vmatprep.subr.bf16.mxu1 %v420_v57 }
  0xf0   :  { %423 = vmatpush3.bf16.msra.mxu1 %v420_v57 }
  0xf1   :  { %v424_v61 = vpack.c.bf16 %v218_v59, %v217_v60 }
  0xf3   :  { %425 = vmatprep.subr.bf16.mxu1 %v424_v61 }
  0xf4   :  { %427 = vmatpush3.bf16.msra.mxu1 %v424_v61 }
  0xf7   :  { %402 = vmatmul.mubr.msk.f32.vlgmr.msra.gmra.mrb[0].mxu1 %vm233_vm1, %v220_v62 }
 0x1ca   :  { %v403_v0 = vpop.f32.mrb[0].mxu1 }
 0x1cb   :  { %v312_v2 = vadd.f32 %v403_v0, %v231_v63  ;;  %v306_v3 = vpop.f32.mrb[1].mxu1 }
 0x1cc   :  { %v307_v4 = vadd.f32 %v306_v3, %v226_v1 }
 0x1cd   :  { %316 = vst [vmem:[#allocation2 + $0x8] sm:$0xff] %v312_v2 }
 0x1ce   :  { %315 = vst [vmem:[#allocation2] sm:$0xff] %v307_v4 }
 0x1cf   :  { %445 = shalt.err (!%p442_p4)
}
 0x1d0   :  { %s446_s15 = scalar_lea.hbm %s591_s5, 256 }
 0x1d1   :  { %p447_p5 = scmp.ne.s32.totalorder %s591_s5, %s446_s15  ;;  %p450_p6 = scmp.lt.u32.totalorder %s446_s15, %s591_s5 }
 0x1d3   :  { %p452_p7 = pnand %p450_p6, %p447_p5 }
 0x1d5   :  { %455 = shalt.err (!%p452_p7)
}
 0x1d6   :  { %s460_s20 = smov 128   ;;  %s461_s21 = smov 8  }
 0x1d7   :  { %328 = dma.vmem_to_hbm [thread:$0]  %s323_s12, 256, %s591_s5, [#allocation3], %s460_s20, %s460_s20, %s461_s21  }
 0x1d8   :  { %456 = dma.done.wait [#allocation3], 256  }
 0x1d9   :  { %457 = vsyncadd [#allocation3], 4294967040 }
 0x1da   :  { %332 = vsyncpa [#allocation3], 1 }

</bundles_post_ra>
